<compile_context>
chip_gen: v5e
topology: v5e:2x2
jax: 0.10.0
libtpu: 0.0.40
codegen_flags: <defaults>
</compile_context>

<pallas_src>
import functools
import math

import jax
import jax.numpy as jnp
from jax.experimental import pallas as pl
from jax.experimental.pallas import tpu as pltpu


# --------------------------------------------------------------------------
# Kernel body
# --------------------------------------------------------------------------
def _dyt_kernel(alpha_ref, gamma_ref, beta_ref, x_ref, o_ref, *, compute_dtype):
    # alpha_ref: SMEM (1, 1) f32 scalar
    # gamma_ref / beta_ref: VMEM (1, tile_cols), resident across row tiles
    # x_ref / o_ref: VMEM (tile_rows, tile_cols)
    alpha = alpha_ref[0, 0].astype(compute_dtype)
    x = x_ref[...].astype(compute_dtype)
    g = gamma_ref[...].astype(compute_dtype)
    b = beta_ref[...].astype(compute_dtype)
    # NOTE: blocks larger than the array (partial last tile) read garbage rows;
    # tanh is bounded so no inf/nan propagation, and masked rows are never
    # written back by Pallas.
    o_ref[...] = (g * jnp.tanh(alpha * x) + b).astype(o_ref.dtype)


# --------------------------------------------------------------------------
# Helpers
# --------------------------------------------------------------------------
def _sublane(dtype):
    # sublane packing factor: rows per vreg for this dtype
    return {4: 8, 2: 16, 1: 32}.get(jnp.dtype(dtype).itemsize, 8)


def _round_up(v, m):
    return -(-v // m) * m


def _tpu_generation():
    """Best-effort TPU generation from the device kind string (0 = unknown)."""
    try:
        kind = jax.devices()[0].device_kind.lower()
    except Exception:
        return 0
    if "v7" in kind or "tpu7" in kind or "7x" in kind:
        return 7
    if "v6" in kind:
        return 6
    if "v5" in kind:
        return 5
    if "v4" in kind:
        return 4
    return 0


def _vmem_capacity_bytes():
    """Physical VMEM capacity; 0 if it cannot be queried."""
    try:
        info = pltpu.get_tpu_info()
        cap = int(getattr(info, "vmem_capacity_bytes", 0))
        if cap > 0:
            return cap
    except Exception:
        pass
    return 0


def _gen_params():
    """(vmem_limit_bytes, default_block_bytes) chosen per TPU generation."""
    gen = _tpu_generation()
    cap = _vmem_capacity_bytes()
    if cap <= 0:
        # v7x has 64 MiB physical VMEM per TC; v5e/v6e have 128 MiB.
        cap = (64 << 20) if (gen >= 7 or gen == 0) else (128 << 20)
    if cap <= (64 << 20):
        # v7x-class: 64 MiB physical -> ~48 MiB scoped, ~4 MiB blocks
        # (x + out double-buffered ~= 4 * block ~= 16 MiB, plenty of headroom).
        return min(48 << 20, cap - (8 << 20)), 4 << 20
    # v5e / v6e-class: 128 MiB physical -> 64 MiB scoped, ~8 MiB blocks.
    return 64 << 20, 8 << 20


def _balance_row_tiles(tile_rows, rows_aligned, sub):
    """Keep >= 2 (even when cheap) row tiles so v7x megacore stays balanced."""
    n = -(-rows_aligned // tile_rows)
    target = n
    if n == 1 and rows_aligned >= 2 * sub:
        target = 2
    elif n > 1 and n % 2 == 1 and rows_aligned >= (n + 1) * sub:
        target = n + 1
    if target != n:
        tile_rows = max(sub, _round_up(-(-rows_aligned // target), sub))
    return tile_rows


def _pick_tiles(rows, cols, dtype, target_block_bytes):
    """Pick (tile_rows, tile_cols) giving ~target_block_bytes per x block."""
    itemsize = jnp.dtype(dtype).itemsize
    sub = _sublane(dtype)
    if cols % 128 == 0:
        # Column tiling only matters for very wide C; cap lanes so that even a
        # sublane-height strip stays within the budget.
        max_cols = max(128, (target_block_bytes // (sub * itemsize)) // 128 * 128)
        tile_cols = min(cols, max_cols)
    else:
        tile_cols = cols  # full width (allowed when not 128-divisible)
    rows_aligned = _round_up(max(rows, 1), sub)
    rows_budget = max(sub, (target_block_bytes // (tile_cols * itemsize)) // sub * sub)
    tile_rows = int(min(rows_budget, rows_aligned))
    tile_rows = _balance_row_tiles(tile_rows, rows_aligned, sub)
    return int(tile_rows), int(tile_cols)


# --------------------------------------------------------------------------
# Public entry point
# --------------------------------------------------------------------------
def dyt(x, alpha, gamma, beta, *, target_block_bytes=None, compute_dtype=None,
        donate_x=False):
    """Apply DyT to x of shape [..., C]. alpha: scalar / shape (1,);
    gamma/beta: shape (C,). Returns array of same shape/dtype as x."""
    orig_shape = x.shape
    C = orig_shape[-1]
    x2 = x.reshape(-1, C)
    R = x2.shape[0]

    vmem_limit, default_block = _gen_params()
    if target_block_bytes is None:
        target_block_bytes = default_block

    gen = _tpu_generation()
    if compute_dtype is None:
        # v6e/v7x have bf16 VPU + EUP: keep bf16 math narrow (halves VALU/EUP
        # work per byte, protects the mem-bound regime at 3.2 TB/s on v7x).
        # v5e (and unknown) stay f32 -- no bf16 VPU/EUP there.
        if x.dtype == jnp.bfloat16 and gen >= 6:
            compute_dtype = jnp.bfloat16
        else:
            compute_dtype = jnp.float32

    gamma_r = jnp.asarray(gamma).reshape(-1)
    beta_r = jnp.asarray(beta).reshape(-1)

    # Lane-dense folding: if C isn't a multiple of 128, fold groups of `fold`
    # consecutive rows so the last dim becomes lcm(C, 128) (full-width stores).
    fold = 1
    if C % 128 != 0:
        f = math.lcm(C, 128) // C
        if R >= f and R % f == 0:
            fold = f
    # TODO(synk): when C % 128 != 0 and R % fold != 0 we still take the
    # masked-store (non-lane-dense) path for the whole array; a split
    # main+remainder scheme avoids the masked stores but adds a full extra
    # HBM copy (slice/concat), which is worse for large inputs.
    if fold > 1:
        R_eff, C_eff = R // fold, C * fold
        x2 = x2.reshape(R_eff, C_eff)          # contiguous view, no copy
        gamma_r = jnp.tile(gamma_r, fold)
        beta_r = jnp.tile(beta_r, fold)
    else:
        R_eff, C_eff = R, C

    gamma_r = gamma_r.reshape(1, C_eff)
    beta_r = beta_r.reshape(1, C_eff)
    alpha_s = jnp.asarray(alpha, dtype=jnp.float32).reshape(1, 1)

    tile_rows, tile_cols = _pick_tiles(R_eff, C_eff, x.dtype, target_block_bytes)
    num_row_tiles = pl.cdiv(R_eff, tile_rows)

    if tile_cols == C_eff:
        # Common case: 1-D grid over row tiles; gamma/beta resident throughout.
        grid = (num_row_tiles,)
        in_specs = [
            pl.BlockSpec(memory_space=pltpu.SMEM),                 # alpha (1,1)
            pl.BlockSpec((1, C_eff), lambda i: (0, 0)),            # gamma
            pl.BlockSpec((1, C_eff), lambda i: (0, 0)),            # beta
            pl.BlockSpec((tile_rows, C_eff), lambda i: (i, 0)),    # x tile
        ]
        out_specs = pl.BlockSpec((tile_rows, C_eff), lambda i: (i, 0))
        dim_semantics = ("parallel",)
    else:
        # Wide-C path: column axis OUTERMOST so gamma/beta stay resident across
        # the inner row loop and x reads stay contiguous as long as possible.
        num_col_tiles = pl.cdiv(C_eff, tile_cols)
        grid = (num_col_tiles, num_row_tiles)
        in_specs = [
            pl.BlockSpec(memory_space=pltpu.SMEM),                       # alpha
            pl.BlockSpec((1, tile_cols), lambda j, i: (0, j)),           # gamma
            pl.BlockSpec((1, tile_cols), lambda j, i: (0, j)),           # beta
            pl.BlockSpec((tile_rows, tile_cols), lambda j, i: (i, j)),   # x tile
        ]
        out_specs = pl.BlockSpec((tile_rows, tile_cols), lambda j, i: (i, j))
        dim_semantics = ("parallel", "parallel")

    itemsize = jnp.dtype(x.dtype).itemsize
    n_elem = R_eff * C_eff
    cost = pl.CostEstimate(
        flops=3 * n_elem,                 # mul + mul + add per element
        transcendentals=n_elem,           # one tanh per element
        bytes_accessed=2 * n_elem * itemsize + 8 * C_eff + 4,
    )

    kernel = functools.partial(_dyt_kernel, compute_dtype=compute_dtype)

    call_kwargs = {}
    if donate_x:
        # x is input index 3 (after alpha, gamma, beta); same shape/dtype as out.
        call_kwargs["input_output_aliases"] = {3: 0}

    out = pl.pallas_call(
        kernel,
        out_shape=jax.ShapeDtypeStruct((R_eff, C_eff), x.dtype),
        grid_spec=pltpu.PrefetchScalarGridSpec(
            num_scalar_prefetch=0,
            grid=grid,
            in_specs=in_specs,
            out_specs=out_specs,
        ),
        compiler_params=pltpu.CompilerParams(
            # All grid axes produce independent output tiles -> megacore-shardable.
            dimension_semantics=dim_semantics,
            vmem_limit_bytes=int(vmem_limit),
        ),
        cost_estimate=cost,
        **call_kwargs,
    )(alpha_s, gamma_r, beta_r, x2)

    return out.reshape(orig_shape)


# --------------------------------------------------------------------------
# Reference + self-test
# --------------------------------------------------------------------------
def _ref_dyt(x, alpha, gamma, beta):
    xf = x.astype(jnp.float32)
    y = gamma.astype(jnp.float32) * jnp.tanh(
        jnp.asarray(alpha, jnp.float32) * xf
    ) + beta.astype(jnp.float32)
    return y.astype(x.dtype)


if __name__ == "__main__":
    key = jax.random.PRNGKey(0)
    init_alpha = 0.5

    def make_case(k, shape, dtype):
        kx, kg, kb = jax.random.split(k, 3)
        C = shape[-1]
        x = jax.random.normal(kx, shape, dtype=jnp.float32).astype(dtype)
        alpha = jnp.ones((1,), dtype=jnp.float32) * init_alpha
        gamma = jnp.ones((C,), jnp.float32) + 0.1 * jax.random.normal(kg, (C,), jnp.float32)
        beta = jnp.zeros((C,), jnp.float32) + 0.1 * jax.random.normal(kb, (C,), jnp.float32)
        return x, alpha, gamma, beta

    cases = [
        ((2, 8, 32), jnp.float32, 1e-5),    # [B,T,C], C<128 -> lane-fold path
        ((4, 16, 128), jnp.float32, 1e-5),  # already lane-dense path
        ((3, 5, 48), jnp.float32, 1e-5),    # non-128 C, fold not possible -> fallback
        ((2, 8, 32), jnp.bfloat16, 2e-2),   # bf16 in (bf16 math on v6e/v7x, f32 on v5e)
    ]

    keys = jax.random.split(key, len(cases))
    for k, (shape, dtype, tol) in zip(keys, cases):
        x, alpha, gamma, beta = make_case(k, shape, dtype)
        y = jax.block_until_ready(dyt(x, alpha, gamma, beta))
        y_ref = _ref_dyt(x, alpha, gamma, beta)
        assert y.shape == x.shape and y.dtype == x.dtype
        assert jnp.allclose(
            y.astype(jnp.float32), y_ref.astype(jnp.float32), atol=tol, rtol=tol
        ), f"mismatch vs reference for shape={shape} dtype={dtype}"

    print("KERNEL_OK")
</pallas_src>

<mosaic_0001>
module attributes {stable_mosaic.version = 11 : i64} {
  func.func @_dyt_kernel(%arg0: i32, %arg1: memref<1x1xf32, #tpu.memory_space<smem>>, %arg2: memref<1x128xf32, #tpu.memory_space<vmem>>, %arg3: memref<1x128xf32, #tpu.memory_space<vmem>>, %arg4: memref<8x128xf32, #tpu.memory_space<vmem>>, %arg5: memref<8x128xf32, #tpu.memory_space<vmem>>) attributes {dimension_semantics = [#tpu.dimension_semantics<parallel>], iteration_bounds = array<i64: 1>, scalar_prefetch = 0 : i64, scratch_operands = 0 : i64, tpu.core_type = #tpu.core_type<tc>, window_params = [{transform_indices = @transform_0, window_bounds = array<i64: 1, 1>}, {pipeline_mode = #tpu.pipeline_mode<synchronous>, transform_indices = @transform_1, window_bounds = array<i64: 1, 128>}, {pipeline_mode = #tpu.pipeline_mode<synchronous>, transform_indices = @transform_2, window_bounds = array<i64: 1, 128>}, {transform_indices = @transform_3, window_bounds = array<i64: 8, 128>}, {transform_indices = @transform_4, window_bounds = array<i64: 8, 128>}]} {
    %c0 = arith.constant 0 : index
    %c0_0 = arith.constant 0 : index
    %0 = memref.load %arg1[%c0, %c0_0] : memref<1x1xf32, #tpu.memory_space<smem>>
    %c0_1 = arith.constant 0 : index
    %c0_2 = arith.constant 0 : index
    %1 = vector.load %arg4[%c0_1, %c0_2] : memref<8x128xf32, #tpu.memory_space<vmem>>, vector<8x128xf32>
    %c0_3 = arith.constant 0 : index
    %c0_4 = arith.constant 0 : index
    %2 = vector.load %arg2[%c0_3, %c0_4] : memref<1x128xf32, #tpu.memory_space<vmem>>, vector<1x128xf32>
    %c0_5 = arith.constant 0 : index
    %c0_6 = arith.constant 0 : index
    %3 = vector.load %arg3[%c0_5, %c0_6] : memref<1x128xf32, #tpu.memory_space<vmem>>, vector<1x128xf32>
    %4 = vector.broadcast %0 : f32 to vector<8x128xf32>
    %5 = arith.mulf %4, %1 : vector<8x128xf32>
    %6 = math.tanh %5 : vector<8x128xf32>
    %7 = vector.broadcast %2 : vector<1x128xf32> to vector<8x128xf32>
    %8 = arith.mulf %7, %6 : vector<8x128xf32>
    %9 = vector.broadcast %3 : vector<1x128xf32> to vector<8x128xf32>
    %10 = arith.addf %8, %9 : vector<8x128xf32>
    %c0_7 = arith.constant 0 : index
    %c0_8 = arith.constant 0 : index
    %11 = vector.load %arg5[%c0_7, %c0_8] : memref<8x128xf32, #tpu.memory_space<vmem>>, vector<8x128xf32>
    tpu.vector_store %arg5[%c0_7, %c0_8], %10 {strides = array<i32>} : memref<8x128xf32, #tpu.memory_space<vmem>>, vector<8x128xf32>,
    return
  }
  func.func @transform_0(%arg0: i32) -> (i32, i32) {
    %c0_i32 = arith.constant 0 : i32
    %c0_i32_0 = arith.constant 0 : i32
    %c0_i32_1 = arith.constant 0 : i32
    return %c0_i32, %c0_i32_0 : i32, i32
  }
  func.func @transform_1(%arg0: i32) -> (i32, i32) {
    %c0_i32 = arith.constant 0 : i32
    %c0_i32_0 = arith.constant 0 : i32
    %c0_i32_1 = arith.constant 0 : i32
    return %c0_i32, %c0_i32_0 : i32, i32
  }
  func.func @transform_2(%arg0: i32) -> (i32, i32) {
    %c0_i32 = arith.constant 0 : i32
    %c0_i32_0 = arith.constant 0 : i32
    %c0_i32_1 = arith.constant 0 : i32
    return %c0_i32, %c0_i32_0 : i32, i32
  }
  func.func @transform_3(%arg0: i32) -> (i32, i32) {
    %c0_i32 = arith.constant 0 : i32
    %c0_i32_0 = arith.constant 0 : i32
    return %arg0, %c0_i32 : i32, i32
  }
  func.func @transform_4(%arg0: i32) -> (i32, i32) {
    %c0_i32 = arith.constant 0 : i32
    %c0_i32_0 = arith.constant 0 : i32
    return %arg0, %c0_i32 : i32, i32
  }
}

</mosaic_0001>

<bundles_post_ra>
// kernel: tpu_custom_call.1
= control target key start
LH: loop header
LB: loop body
LE: loop exit
PB: predicated region body
PF: predicated region fallthrough
CT: control target
= control target key end

     0   :  { %10 = vsyncpa [#allocation4], 0  ;;  %s174_s0 = inlined_call_operand.<no memory space> [shape: f32[1,1], index: 0, kind: input, shape index: {}]   ;;  %s175_s1 = inlined_call_operand.vmem [shape: f32[1,128], index: 1, kind: input, shape index: {}]   ;;  %s176_s2 = inlined_call_operand.vmem [shape: f32[1,128], index: 2, kind: input, shape index: {}]   ;;  %s177_s3 = inlined_call_operand.hbm [shape: f32[4,128], index: 3, kind: input, shape index: {}]   ;;  %s178_s4 = inlined_call_operand.hbm [shape: f32[4,128], index: 4, kind: output, shape index: {}]  }
   0x1   :  { %11 = vsyncpa [#allocation5], 0 }
   0x2   :  { %21 = vsyncadd [#allocation4], 64  ;;  %s22_s17 = sshll.u32 %s177_s3, 4  ;;  %s130_s18 = smov [#allocation3]   ;;  %s23_s17 = int_to_ptr.hbm [resolvable:$true] %s22_s17 }
   0x3   :  { %s24_s19 = sshll.u32 %s130_s18, 4  ;;  %s131_s20 = smov 64   ;;  %s25_s19 = int_to_ptr.vmem [resolvable:$true] %s24_s19 }
   0x4   :  { %s132_s21 = smov 4  }
   0x5   :  { %30 = dma.hbm_to_vmem [thread:$0]  %s23_s17, 64, %s25_s19, [#allocation4], %s131_s20, %s131_s20, %s132_s21  }
   0x6   :  { %126 = dma.done.wait [#allocation4], 128  }
   0x7   :  { %127 = vsyncadd [#allocation4], 4294967168  ;;  %v39_v0 = vstv %s174_s0  ;;  %v36_v1 = vld [vmem:[#allocation3] sm:$0xff] }
   0x8   :  { %v40_v2 = vmul.f32 %v39_v0, %v36_v1  ;;  %v74_v3 = vld [vmem:[%s175_s1] ss:$0 sm:$0xff] }
   0x9   :  { %v75_v4 = vld [vmem:[%s176_s2] ss:$0 sm:$0xff] }
   0xa   :  { %76 = vtanh.f32 %v40_v2 }
  0x10   :  { %v77_v5 = vpop.eup %76 }
  0x11   :  { %v45_v6 = vmul.f32 %v77_v5, %v74_v3 }
  0x13   :  { %v49_v7 = vadd.f32 %v75_v4, %v45_v6 }
  0x15   :  { %50 = vst [vmem:[#allocation6] sm:$0xff] %v49_v7 }
  0x16   :  { %54 = vsyncadd [#allocation5], 64  ;;  %s57_s0 = sshll.u32 %s178_s4, 4  ;;  %s133_s29 = smov [#allocation6]   ;;  %s58_s0 = int_to_ptr.hbm [resolvable:$true] %s57_s0 }
  0x17   :  { %s55_s30 = sshll.u32 %s133_s29, 4  ;;  %s56_s30 = int_to_ptr.vmem [resolvable:$true] %s55_s30 }
  0x18   :  { %63 = dma.vmem_to_hbm [thread:$0]  %s56_s30, 64, %s58_s0, [#allocation5], %s131_s20, %s131_s20, %s132_s21  }
  0x19   :  { %128 = dma.done.wait [#allocation5], 128  }
  0x1a   :  { %129 = vsyncadd [#allocation5], 4294967168 }
  0x1b   :  { %68 = vsyncpa [#allocation4], 1 }
  0x1c   :  { %69 = vsyncpa [#allocation5], 1 }

</bundles_post_ra>
